<compile_context>
chip_gen: v7x
topology: tpu7x:2x2x1
jax: 0.10.0
libtpu: 0.0.40
codegen_flags: <defaults>
</compile_context>

<pallas_src>
import functools

import jax
import jax.numpy as jnp
from jax.experimental import pallas as pl
from jax.experimental.pallas import tpu as pltpu


# ----------------------------------------------------------------------------
# Helpers
# ----------------------------------------------------------------------------
def _round_up(a, b):
    return (a + b - 1) // b * b


def _vmem_limit_bytes():
    # Scoped VMEM limit per generation; safe fallback for v5e / v6e / v7x.
    try:
        cap = pltpu.get_tpu_info().vmem_capacity_bytes
        return min(int(cap * 3 // 4), 100 << 20)
    except Exception:
        return 48 << 20


def _select_tiles(F, H, compute_dtype, out_dtype, vmem_budget):
    """Pick (tm, tn) -- largest token tile (the AI lever) that fits VMEM."""
    c = jnp.dtype(compute_dtype).itemsize
    o = jnp.dtype(out_dtype).itemsize
    use_scratch = jnp.dtype(out_dtype) != jnp.dtype(jnp.float32)
    budget = max(vmem_budget - (4 << 20), 8 << 20)   # headroom for internal scratch

    tn_cands = [t for t in (512, 256) if t <= H] or [H]
    tm_cands = (1024, 768, 512, 256)
    for tm in tm_cands:
        for tn in tn_cands:
            footprint = (
                2 * tm * F * c            # x block, double-buffered
                + 2 * 3 * F * tn * c      # gate + up + down weight tiles, double-buffered
                + 2 * tm * F * o          # output block, double-buffered
                + (tm * F * 4 if use_scratch else 0)   # f32 accumulator scratch
                + 3 * tm * tn * 4         # f32 gate/up/a compiler temporaries
            )
            if footprint <= budget:
                return tm, tn
    return 256, tn_cands[-1]


# ----------------------------------------------------------------------------
# Kernels
# ----------------------------------------------------------------------------
def _mlp_kernel_f32out(x_ref, wg_ref, wu_ref, w2_ref, o_ref):
    # f32 output: the output block index is (i, 0) -> resident across the
    # hidden axis j, so it doubles as the f32 accumulator (saves tm*F*4 B VMEM).
    @pl.when(pl.program_id(1) == 0)
    def _():
        o_ref[...] = jnp.zeros_like(o_ref)

    x = x_ref[...]
    gate = jnp.dot(x, wg_ref[...], preferred_element_type=jnp.float32)
    up = jnp.dot(x, wu_ref[...], preferred_element_type=jnp.float32)
    a = (gate * jax.nn.sigmoid(gate)) * up          # silu(gate) * up, in f32
    o_ref[...] += jnp.dot(a.astype(w2_ref.dtype), w2_ref[...],
                          preferred_element_type=jnp.float32)


def _mlp_kernel_scratch(x_ref, wg_ref, wu_ref, w2_ref, o_ref, acc_ref):
    # Narrow output dtype: accumulate in a separate f32 scratch, cast at the end.
    j = pl.program_id(1)

    @pl.when(j == 0)
    def _():
        acc_ref[...] = jnp.zeros_like(acc_ref)

    x = x_ref[...]
    gate = jnp.dot(x, wg_ref[...], preferred_element_type=jnp.float32)
    up = jnp.dot(x, wu_ref[...], preferred_element_type=jnp.float32)
    a = (gate * jax.nn.sigmoid(gate)) * up
    acc_ref[...] += jnp.dot(a.astype(w2_ref.dtype), w2_ref[...],
                            preferred_element_type=jnp.float32)

    @pl.when(j == pl.num_programs(1) - 1)
    def _():
        o_ref[...] = acc_ref[...].astype(o_ref.dtype)


# ----------------------------------------------------------------------------
# Weight preparation (run ONCE, outside the hot path)
# ----------------------------------------------------------------------------
def prepare_mlp_weights(w1_t, w2_t, *, tn=256, compute_dtype=jnp.bfloat16):
    """Split fused fc1 into gate/up halves, zero-pad the hidden dim to a
    multiple of tn, and cast to the MXU compute dtype.  Returns
    ((wg, wu, w2), tn_eff)."""
    F, H2 = w1_t.shape
    H = H2 // 2
    assert w2_t.shape == (H, F)

    wg = w1_t[:, :H]          # matches torch chunk(2, dim=-1): gate first
    wu = w1_t[:, H:]

    tn_eff = tn if H > tn else H
    Hp = _round_up(H, tn_eff)
    if Hp != H:
        pad = Hp - H
        wg = jnp.pad(wg, ((0, 0), (0, pad)))
        wu = jnp.pad(wu, ((0, 0), (0, pad)))
        w2 = jnp.pad(w2_t, ((0, pad), (0, 0)))
    else:
        w2 = w2_t

    return (wg.astype(compute_dtype), wu.astype(compute_dtype),
            w2.astype(compute_dtype)), tn_eff


# ----------------------------------------------------------------------------
# Forward
# ----------------------------------------------------------------------------
@functools.partial(jax.jit, static_argnames=("tm", "tn"))
def mlp_forward(x, wg, wu, w2, *, tm=512, tn=256):
    """x: [..., F]; wg/wu: [F, Hp]; w2: [Hp, F] (pre-split/padded/cast)."""
    F = x.shape[-1]
    Hp = w2.shape[0]
    assert wg.shape == (F, Hp) and wu.shape == (F, Hp) and w2.shape == (Hp, F)
    assert Hp % tn == 0, "weights must be prepared with the same tn"

    lead = x.shape[:-1]
    x2d = x.reshape(-1, F)
    T = x2d.shape[0]
    out_dtype = x.dtype
    compute_dtype = wg.dtype

    # Token tile: as large as the VMEM budget allowed (tm), clamped to the
    # padded token count; with enough tokens, keep >= 2 tiles for megacore.
    tm_eff = min(tm, _round_up(T, 16))
    if T >= 512:
        tm_eff = min(tm_eff, _round_up(-(-T // 2), 256))
    tm_eff = max(16, _round_up(tm_eff, 16))
    Tp = _round_up(T, tm_eff)

    if Tp != T:
        x2d = jnp.pad(x2d, ((0, Tp - T), (0, 0)))
    x2d = x2d.astype(compute_dtype)

    grid = (Tp // tm_eff, Hp // tn)
    num_tok_tiles = grid[0]

    c_item = jnp.dtype(compute_dtype).itemsize
    o_item = jnp.dtype(out_dtype).itemsize
    cost = pl.CostEstimate(
        flops=6 * Tp * F * Hp,                        # gate + up + down matmuls
        transcendentals=Tp * Hp,                      # sigmoid
        bytes_accessed=(Tp * F * c_item               # activations in
                        + num_tok_tiles * 3 * F * Hp * c_item   # weight re-reads per tile
                        + Tp * F * o_item),           # output writeback
    )

    if jnp.dtype(out_dtype) == jnp.dtype(jnp.float32):
        kernel = _mlp_kernel_f32out
        scratch_shapes = []
    else:
        kernel = _mlp_kernel_scratch
        scratch_shapes = [pltpu.VMEM((tm_eff, F), jnp.float32)]

    out2d = pl.pallas_call(
        kernel,
        out_shape=jax.ShapeDtypeStruct((Tp, F), out_dtype),
        grid_spec=pltpu.PrefetchScalarGridSpec(
            num_scalar_prefetch=0,
            grid=grid,
            in_specs=[
                pl.BlockSpec((tm_eff, F), lambda i, j: (i, 0)),   # x tokens
                pl.BlockSpec((F, tn), lambda i, j: (0, j)),       # gate weights
                pl.BlockSpec((F, tn), lambda i, j: (0, j)),       # up weights
                pl.BlockSpec((tn, F), lambda i, j: (j, 0)),       # down weights
            ],
            out_specs=pl.BlockSpec((tm_eff, F), lambda i, j: (i, 0)),
            scratch_shapes=scratch_shapes,
        ),
        compiler_params=pltpu.CompilerParams(
            dimension_semantics=("parallel", "arbitrary"),
            vmem_limit_bytes=_vmem_limit_bytes(),
        ),
        cost_estimate=cost,
    )(x2d, wg, wu, w2)

    return out2d[:T].reshape(*lead, F)


# ----------------------------------------------------------------------------
# Reference + test
# ----------------------------------------------------------------------------
def _reference(x, w1_t, w2_t):
    h = jnp.dot(x, w1_t)
    x1, x2 = jnp.split(h, 2, axis=-1)
    a = jax.nn.silu(x1) * x2
    return jnp.dot(a, w2_t)


if __name__ == "__main__":
    key = jax.random.PRNGKey(0)
    k_x, k_w1, k_w2 = jax.random.split(key, 3)

    batch, seq, fan_in = 2, 8, 32
    fan_h2 = 4 * fan_in          # hidden dim (per gate/up half)
    fan_h1 = 2 * fan_h2          # fused fc1 output (gate | up)

    x = jax.random.normal(k_x, (batch, seq, fan_in), dtype=jnp.float32)
    # PyTorch stores W as [out, in]; we build the transposed [in, out] layout.
    w1_t = jax.random.normal(k_w1, (fan_in, fan_h1), dtype=jnp.float32) * 0.05
    w2_t = jax.random.normal(k_w2, (fan_h2, fan_in), dtype=jnp.float32) * 0.05

    # One-time setup (outside the hot path): tile selection + weight prep.
    compute_dtype = jnp.bfloat16
    tm, tn = _select_tiles(fan_in, fan_h2, compute_dtype, x.dtype,
                           _vmem_limit_bytes())
    (wg, wu, w2), tn_eff = prepare_mlp_weights(
        w1_t, w2_t, tn=tn, compute_dtype=compute_dtype)

    out = mlp_forward(x, wg, wu, w2, tm=tm, tn=tn_eff)
    jax.block_until_ready(out)

    ref = _reference(x, w1_t, w2_t)
    assert out.shape == (batch, seq, fan_in)
    # bf16 MXU compute vs f32 reference -> loose but meaningful tolerance.
    assert jnp.allclose(out, ref, atol=5e-3, rtol=5e-2), (
        float(jnp.max(jnp.abs(out - ref))))

    # Also exercise the non-f32-output path (scratch accumulator variant).
    out_bf16 = mlp_forward(x.astype(jnp.bfloat16), wg, wu, w2, tm=tm, tn=tn_eff)
    jax.block_until_ready(out_bf16)
    assert out_bf16.dtype == jnp.bfloat16
    assert jnp.allclose(out_bf16.astype(jnp.float32), ref, atol=1e-2, rtol=1e-1), (
        float(jnp.max(jnp.abs(out_bf16.astype(jnp.float32) - ref))))

    print("KERNEL_OK")
</pallas_src>

<mosaic_0001>
module attributes {stable_mosaic.version = 11 : i64} {
  func.func @_mlp_kernel_f32out(%arg0: i32, %arg1: i32, %arg2: memref<16x32xbf16, #tpu.memory_space<vmem>>, %arg3: memref<32x128xbf16, #tpu.memory_space<vmem>>, %arg4: memref<32x128xbf16, #tpu.memory_space<vmem>>, %arg5: memref<128x32xbf16, #tpu.memory_space<vmem>>, %arg6: memref<16x32xf32, #tpu.memory_space<vmem>>) attributes {dimension_semantics = [#tpu.dimension_semantics<parallel>, #tpu.dimension_semantics<arbitrary>], iteration_bounds = array<i64: 1, 1>, scalar_prefetch = 0 : i64, scratch_operands = 0 : i64, tpu.core_type = #tpu.core_type<tc>, window_params = [{transform_indices = @transform_0, window_bounds = array<i64: 16, 32>}, {transform_indices = @transform_1, window_bounds = array<i64: 32, 128>}, {transform_indices = @transform_2, window_bounds = array<i64: 32, 128>}, {transform_indices = @transform_3, window_bounds = array<i64: 128, 32>}, {transform_indices = @transform_4, window_bounds = array<i64: 16, 32>}]} {
    %c0_i32 = arith.constant 0 : i32
    %0 = arith.cmpi eq, %arg1, %c0_i32 : i32
    %1 = arith.extui %0 : i1 to i32
    %c0_i32_0 = arith.constant 0 : i32
    %2 = arith.cmpi ne, %1, %c0_i32_0 : i32
    scf.if %2 {
      %cst_15 = arith.constant 0.000000e+00 : f32
      %21 = vector.broadcast %cst_15 : f32 to vector<16x32xf32>
      %c0_16 = arith.constant 0 : index
      %c0_17 = arith.constant 0 : index
      %22 = vector.load %arg6[%c0_16, %c0_17] : memref<16x32xf32, #tpu.memory_space<vmem>>, vector<16x32xf32>
      tpu.vector_store %arg6[%c0_16, %c0_17], %21 {strides = array<i32>} : memref<16x32xf32, #tpu.memory_space<vmem>>, vector<16x32xf32>,
    } else {
    }
    %c0 = arith.constant 0 : index
    %c0_1 = arith.constant 0 : index
    %3 = vector.load %arg2[%c0, %c0_1] : memref<16x32xbf16, #tpu.memory_space<vmem>>, vector<16x32xbf16>
    %c0_2 = arith.constant 0 : index
    %c0_3 = arith.constant 0 : index
    %4 = vector.load %arg3[%c0_2, %c0_3] : memref<32x128xbf16, #tpu.memory_space<vmem>>, vector<32x128xbf16>
    %cst = arith.constant dense<0.000000e+00> : vector<16x128xf32>
    %5 = tpu.matmul %3, %4, %cst {dimension_numbers = #tpu.dot_dimension_numbers<[1], [0], [0], [1], [0, 0, 1, 1], [], []>} : vector<16x32xbf16>, vector<32x128xbf16>, vector<16x128xf32> -> vector<16x128xf32>
    %c0_4 = arith.constant 0 : index
    %c0_5 = arith.constant 0 : index
    %6 = vector.load %arg4[%c0_4, %c0_5] : memref<32x128xbf16, #tpu.memory_space<vmem>>, vector<32x128xbf16>
    %cst_6 = arith.constant dense<0.000000e+00> : vector<16x128xf32>
    %7 = tpu.matmul %3, %6, %cst_6 {dimension_numbers = #tpu.dot_dimension_numbers<[1], [0], [0], [1], [0, 0, 1, 1], [], []>} : vector<16x32xbf16>, vector<32x128xbf16>, vector<16x128xf32> -> vector<16x128xf32>
    %8 = arith.negf %5 : vector<16x128xf32>
    %9 = math.exp %8 : vector<16x128xf32>
    %cst_7 = arith.constant 1.000000e+00 : f32
    %10 = vector.broadcast %cst_7 : f32 to vector<16x128xf32>
    %11 = arith.addf %10, %9 : vector<16x128xf32>
    %12 = arith.divf %10, %11 : vector<16x128xf32>
    %13 = arith.mulf %5, %12 : vector<16x128xf32>
    %14 = arith.mulf %13, %7 : vector<16x128xf32>
    %c0_8 = arith.constant 0 : index
    %c0_9 = arith.constant 0 : index
    %15 = vector.load %arg6[%c0_8, %c0_9] : memref<16x32xf32, #tpu.memory_space<vmem>>, vector<16x32xf32>
    %16 = arith.truncf %14 : vector<16x128xf32> to vector<16x128xbf16>
    %c0_10 = arith.constant 0 : index
    %c0_11 = arith.constant 0 : index
    %17 = vector.load %arg5[%c0_10, %c0_11] : memref<128x32xbf16, #tpu.memory_space<vmem>>, vector<128x32xbf16>
    %cst_12 = arith.constant dense<0.000000e+00> : vector<16x32xf32>
    %18 = tpu.matmul %16, %17, %cst_12 {dimension_numbers = #tpu.dot_dimension_numbers<[1], [0], [0], [1], [0, 0, 1, 1], [], []>} : vector<16x128xbf16>, vector<128x32xbf16>, vector<16x32xf32> -> vector<16x32xf32>
    %19 = arith.addf %15, %18 : vector<16x32xf32>
    %c0_13 = arith.constant 0 : index
    %c0_14 = arith.constant 0 : index
    %20 = vector.load %arg6[%c0_13, %c0_14] : memref<16x32xf32, #tpu.memory_space<vmem>>, vector<16x32xf32>
    tpu.vector_store %arg6[%c0_13, %c0_14], %19 {strides = array<i32>} : memref<16x32xf32, #tpu.memory_space<vmem>>, vector<16x32xf32>,
    return
  }
  func.func @transform_0(%arg0: i32, %arg1: i32) -> (i32, i32) {
    %c0_i32 = arith.constant 0 : i32
    %c0_i32_0 = arith.constant 0 : i32
    return %arg0, %c0_i32 : i32, i32
  }
  func.func @transform_1(%arg0: i32, %arg1: i32) -> (i32, i32) {
    %c0_i32 = arith.constant 0 : i32
    %c0_i32_0 = arith.constant 0 : i32
    return %c0_i32, %arg1 : i32, i32
  }
  func.func @transform_2(%arg0: i32, %arg1: i32) -> (i32, i32) {
    %c0_i32 = arith.constant 0 : i32
    %c0_i32_0 = arith.constant 0 : i32
    return %c0_i32, %arg1 : i32, i32
  }
  func.func @transform_3(%arg0: i32, %arg1: i32) -> (i32, i32) {
    %c0_i32 = arith.constant 0 : i32
    %c0_i32_0 = arith.constant 0 : i32
    return %arg1, %c0_i32 : i32, i32
  }
  func.func @transform_4(%arg0: i32, %arg1: i32) -> (i32, i32) {
    %c0_i32 = arith.constant 0 : i32
    %c0_i32_0 = arith.constant 0 : i32
    return %arg0, %c0_i32 : i32, i32
  }
}

</mosaic_0001>

<bundles_post_ra>
// kernel: mlp_forward.1
= control target key start
LH: loop header
LB: loop body
LE: loop exit
PB: predicated region body
PF: predicated region fallthrough
CT: control target
= control target key end

     0   :  { %v413_v1 = vmov 0.0   ;;  %vm414_vm0 = vmmov 0   ;;  %vm23_vm1 = vcmask 261120   ;;  %s500_s0 = inlined_call_operand.vmem [shape: bf16[16,32], index: 0, kind: input, shape index: {}]   ;;  %s501_s1 = inlined_call_operand.vmem [shape: bf16[32,128], index: 1, kind: input, shape index: {}]   ;;  %s502_s2 = inlined_call_operand.vmem [shape: bf16[32,128], index: 2, kind: input, shape index: {}]   ;;  %s503_s3 = inlined_call_operand.vmem [shape: bf16[128,32], index: 3, kind: input, shape index: {}]   ;;  %s504_s4 = inlined_call_operand.hbm [shape: f32[16,32], index: 4, kind: output, shape index: {}]  }
   0x1   :  { %v368_v0 = vld [vmem:[%s501_s1] sm:$0xff]   ;;  %327 = vmatprep.subr.bf16.mxu1 %v413_v1  ;;  %343 = vmatprep.subr.bf16.mxu0 %v413_v1  ;;  %v369_v2 = vld [vmem:[%s501_s1 + $0x8] sm:$0xff]   ;;  %24 = vst.msk [vmem:[#allocation2] sm:$0xff] %vm23_vm1, %v413_v1  ;;  %25 = vst.msk [vmem:[#allocation2 + $0x8] sm:$0xff] %vm23_vm1, %v413_v1 }
   0x2   :  { %328 = vmatpush3.bf16.msra.mxu1 %v368_v0  ;;  %331 = vmatprep.mubr.msk.bf16.mxu1 %vm414_vm0, %v413_v1  ;;  %v370_v3 = vld [vmem:[%s500_s0] sm:$0xff]   ;;  %v372_v5 = vld [vmem:[%s502_s2 + $0x8] sm:$0xff]  }
   0x3   :  { %329 = vmatprep.subr.bf16.mxu1 %v413_v1  ;;  %359 = vmatprep.mubr.msk.bf16.mxu0 %vm414_vm0, %v413_v1  ;;  %v371_v4 = vld [vmem:[%s502_s2] sm:$0xff]  }
   0x6   :  { %330 = vmatpush3.bf16.msra.mxu1 %v369_v2 }
   0x7   :  { %335 = vmatprep.subr.bf16.mxu1 %v413_v1 }
   0x9   :  { %332 = vmatmul.mubr.msk.bf16.vlgmr.msra.gmra.mrb[0].mxu1 %vm23_vm1, %v370_v3 }
   0xa   :  { %336 = vmatpush3.bf16.msra.mxu1 %v371_v4  ;;  %339 = vmatprep.mubr.msk.bf16.mxu1 %vm414_vm0, %v413_v1 }
   0xb   :  { %9 = vsyncpa [#allocation3], 0  ;;  %337 = vmatprep.subr.bf16.mxu1 %v413_v1  ;;  %v373_v6 = vld [vmem:[%s503_s3] sm:$0xff]   ;;  %v374_v7 = vld [vmem:[%s503_s3 + $0x8] sm:$0xff]  }
   0xc   :  { %344 = vmatpush3.bf16.msra.mxu0 %v373_v6  ;;  %v375_v8 = vld [vmem:[%s503_s3 + $0x10] sm:$0xff]   ;;  %v376_v9 = vld [vmem:[%s503_s3 + $0x18] sm:$0xff]   ;;  %v377_v10 = vld [vmem:[%s503_s3 + $0x20] sm:$0xff]  }
   0xd   :  { %345 = vmatprep.subr.bf16.mxu0 %v413_v1  ;;  %v378_v11 = vld [vmem:[%s503_s3 + $0x28] sm:$0xff]   ;;  %v379_v12 = vld [vmem:[%s503_s3 + $0x30] sm:$0xff]   ;;  %v380_v13 = vld [vmem:[%s503_s3 + $0x38] sm:$0xff]   ;;  %s415_s3 = smov [#allocation2]  }
   0xe   :  { %338 = vmatpush3.bf16.msra.mxu1 %v372_v5  ;;  %v167_v35 = vld [vmem:[#allocation2] sm:$0xff]  ;;  %s284_s12 = sshll.u32 %s415_s3, 4  ;;  %v168_v37 = vld [vmem:[#allocation2 + $0x8] sm:$0xff]  ;;  %s285_s12 = int_to_ptr.vmem [resolvable:$true] %s284_s12 }
   0xf   :  { %s389_s13 = scalar_lea.vmem %s285_s12, 256  ;;  %p394_p1 = scmp.lt.s32.totalorder %s285_s12, %s285_s12 }
  0x10   :  { %346 = vmatpush3.bf16.msra.mxu0 %v374_v7  ;;  %p390_p0 = scmp.ne.s32.totalorder %s285_s12, %s389_s13  ;;  %p395_p2 = scmp.lt.s32.totalorder %s389_s13, %s389_s13 }
  0x11   :  { %340 = vmatmul.mubr.msk.bf16.vlgmr.msra.gmra.mrb[4].mxu1 %vm23_vm1, %v370_v3  ;;  %347 = vmatprep.subr.bf16.mxu0 %v413_v1 }
  0x12   :  { %p396_p3 = por %p395_p2, %p394_p1 }
  0x14   :  { %348 = vmatpush3.bf16.msra.mxu0 %v375_v8  ;;  %p397_p4 = pnand %p396_p3, %p390_p0 }
  0x15   :  { %349 = vmatprep.subr.bf16.mxu0 %v413_v1 }
  0x18   :  { %350 = vmatpush3.bf16.msra.mxu0 %v376_v9 }
  0x19   :  { %351 = vmatprep.subr.bf16.mxu0 %v413_v1 }
  0x1c   :  { %352 = vmatpush3.bf16.msra.mxu0 %v377_v10 }
  0x1d   :  { %353 = vmatprep.subr.bf16.mxu0 %v413_v1 }
  0x20   :  { %354 = vmatpush3.bf16.msra.mxu0 %v378_v11 }
  0x21   :  { %355 = vmatprep.subr.bf16.mxu0 %v413_v1 }
  0x24   :  { %356 = vmatpush3.bf16.msra.mxu0 %v379_v12 }
  0x25   :  { %357 = vmatprep.subr.bf16.mxu0 %v413_v1 }
  0x28   :  { %358 = vmatpush3.bf16.msra.mxu0 %v380_v13 }
  0xdc   :  { %v87_v14 = vpop.f32.mrb[0].mxu1 }
  0xdd   :  { %v302_v15 = vmul.f32 -1.442695, %v87_v14  ;;  %v333_v16 = vpop.f32.mrb[1].mxu1 }
  0xde   :  { %v90_v17 = vpop.f32.mrb[2].mxu1 }
  0xdf   :  { %381 = vpow2.f32 %v302_v15  ;;  %v303_v18 = vmul.f32 -1.442695, %v90_v17  ;;  %v334_v19 = vpop.f32.mrb[3].mxu1 }
  0xe1   :  { %383 = vpow2.f32 %v303_v18 }
  0xe4   :  { %v144_v20 = vpop.f32.mrb[4].mxu1 }
  0xe5   :  { %v341_v21 = vpop.f32.mrb[5].mxu1 }
  0xe6   :  { %v147_v22 = vpop.f32.mrb[6].mxu1 }
  0xe7   :  { %v342_v23 = vpop.f32.mrb[7].mxu1 }
  0xe9   :  { %v382_v24 = vpop.eup %381 }
  0xea   :  { %v157_v25 = vadd.f32 1.0, %v382_v24 }
  0xeb   :  { %v384_v26 = vpop.eup %383 }
  0xec   :  { %385 = vrcp.f32 %v157_v25  ;;  %v158_v27 = vadd.f32 1.0, %v384_v26 }
  0xee   :  { %387 = vrcp.f32 %v158_v27 }
  0xf6   :  { %v386_v28 = vpop.eup %385 }
  0xf7   :  { %v163_v29 = vmul.f32 %v386_v28, %v87_v14 }
  0xf8   :  { %v388_v30 = vpop.eup %387 }
  0xf9   :  { %v164_v31 = vmul.f32 %v388_v30, %v90_v17  ;;  %v165_v32 = vmul.f32 %v163_v29, %v144_v20 }
  0xfb   :  { %v166_v33 = vmul.f32 %v164_v31, %v147_v22 }
  0xfd   :  { %v169_v34 = vpack.c.bf16 %v166_v33, %v165_v32 }
  0xff   :  { %360 = vmatmul.mubr.bf16.vlgmr.msra.gmra.mrb[0].mxu0 %v169_v34 }
 0x1d2   :  { %v268_v36 = vpop.f32.mrb[0].mxu0 }
 0x1d3   :  { %v275_v38 = vadd.f32 %v268_v36, %v167_v35  ;;  %v361_v39 = vpop.f32.mrb[1].mxu0 }
 0x1d4   :  { %v271_v40 = vpop.f32.mrb[2].mxu0 }
 0x1d5   :  { %277 = vst.msk [vmem:[#allocation2] sm:$0xff] %vm23_vm1, %v275_v38  ;;  %v276_v41 = vadd.f32 %v271_v40, %v168_v37  ;;  %v362_v42 = vpop.f32.mrb[3].mxu0 }
 0x1d7   :  { %278 = vst.msk [vmem:[#allocation2 + $0x8] sm:$0xff] %vm23_vm1, %v276_v41 }
 0x1d8   :  { %400 = shalt.err (!%p397_p4)
}
 0x1d9   :  { %s401_s16 = scalar_lea.hbm %s504_s4, 256 }
 0x1da   :  { %p402_p5 = scmp.ne.s32.totalorder %s504_s4, %s401_s16  ;;  %p405_p6 = scmp.lt.u32.totalorder %s401_s16, %s504_s4 }
 0x1dc   :  { %p407_p7 = pnand %p405_p6, %p402_p5 }
 0x1de   :  { %410 = shalt.err (!%p407_p7)
}
 0x1df   :  { %s416_s21 = smov 128   ;;  %s417_s22 = smov 8  }
 0x1e0   :  { %290 = dma.vmem_to_hbm [thread:$0]  %s285_s12, 256, %s504_s4, [#allocation3], %s416_s21, %s416_s21, %s417_s22  }
 0x1e1   :  { %411 = dma.done.wait [#allocation3], 256  }
 0x1e2   :  { %412 = vsyncadd [#allocation3], 4294967040 }
 0x1e3   :  { %294 = vsyncpa [#allocation3], 1 }

</bundles_post_ra>
